<compile_context>
chip_gen: v6e
topology: v6e:2x2x1
jax: 0.10.0
libtpu: 0.0.40
codegen_flags: <defaults>
</compile_context>

<pallas_src>
import jax
import jax.numpy as jnp
from jax.experimental import pallas as pl
from jax.experimental.pallas import tpu as pltpu

_LANE = 128
_F32 = 4
_VMEM_BUDGET = 40 * 1024 * 1024      # conservative: leaves headroom on v7x (64 MiB VMEM)
_VMEM_LIMIT_CAP = 56 * 1024 * 1024   # never request more scoped VMEM than this
_MAX_TILE_N = 2048


def _round_up(v: int, m: int) -> int:
    return ((v + m - 1) // m) * m


# ----------------------------- kernels --------------------------------------


def _pca_kernel(x_ref, dvt_t_ref, bias_ref, o_ref):
    # Single K block: out = x @ dvt_t - bias   (bias = mean @ dvt.T, folded).
    o_ref[...] = (
        jnp.dot(x_ref[...], dvt_t_ref[...], preferred_element_type=jnp.float32)
        - bias_ref[...]
    ).astype(o_ref.dtype)


def _pca_kernel_ksplit(x_ref, dvt_t_ref, bias_ref, o_ref, acc_ref):
    # K-tiled: accumulate partial products; subtract bias + store on last step.
    k = pl.program_id(1)

    @pl.when(k == 0)
    def _():
        acc_ref[...] = jnp.zeros_like(acc_ref)

    acc_ref[...] += jnp.dot(
        x_ref[...], dvt_t_ref[...], preferred_element_type=jnp.float32
    )

    @pl.when(k == pl.num_programs(1) - 1)
    def _():
        o_ref[...] = (acc_ref[...] - bias_ref[...]).astype(o_ref.dtype)


# --------------------------- one-time precompute ----------------------------


def pca_precompute(mean, dvt):
    """One-time (model-load) prep of the fixed trained buffers.

    Returns:
      dvt_t: dvt.T zero-padded to lane-dense (dim1_p, dim2_p)
      bias:  mean @ dvt.T  (1, dim2_p), so the kernel computes
             x @ dvt_t - bias  ==  (x - mean) @ dvt.T
    """
    dim2, dim1 = dvt.shape
    dim1_p = _round_up(max(dim1, 1), _LANE)
    dim2_p = _round_up(max(dim2, 1), _LANE)
    dvt_p = jnp.pad(dvt.astype(jnp.float32),
                    ((0, dim2_p - dim2), (0, dim1_p - dim1)))
    mean_p = jnp.pad(mean.astype(jnp.float32), ((0, 0), (0, dim1_p - dim1)))
    dvt_t = dvt_p.T                      # (dim1_p, dim2_p)
    bias = jnp.dot(mean_p, dvt_t)        # (1, dim2_p)
    return dvt_t, bias


# ------------------------------ tile selection -------------------------------


def _select_tiles(n, dim1_p, dim2_p):
    """Pick (tile_n, tile_k); tile_k always divides dim1_p."""
    bias_bytes = 2 * dim2_p * _F32       # bias, double-buffered (tiny)

    def rows_that_fit(tile_k, with_acc):
        # dvt_t block: assume default double-buffering (2x) to be safe even
        # though its block index is constant across the row axis.
        resident = 2 * tile_k * dim2_p * _F32 + bias_bytes
        per_row = 2 * _F32 * (tile_k + dim2_p)       # double-buffered x + out
        if with_acc:
            per_row += _F32 * dim2_p                 # f32 accumulator scratch
        avail = _VMEM_BUDGET - resident
        return max(avail // per_row, 0) if avail > 0 else 0

    # Path 1: dvt_t fully resident (single K block).
    max_rows = rows_that_fit(dim1_p, with_acc=False)
    if max_rows >= min(n, 256):
        tile_k = dim1_p
        tile_n = min(max_rows, _MAX_TILE_N)
    else:
        # Path 2: K-tiling — stream dvt_t in (tile_k, dim2_p) chunks so the
        # row tile stays MXU-friendly (>= 256) for wide-feature PCA.
        k_blocks = dim1_p // _LANE
        tile_k = _LANE
        for div in range(k_blocks, 0, -1):
            if k_blocks % div == 0 and rows_that_fit(div * _LANE, True) >= 256:
                tile_k = div * _LANE
                break
        tile_n = min(rows_that_fit(tile_k, with_acc=True), _MAX_TILE_N)

    # Clamp / align the row tile.
    if tile_n >= n:
        tile_n = n                        # single row block (full extent legal)
    elif tile_n >= 256:
        tile_n = (tile_n // 256) * 256    # MXU-pass aligned
    elif tile_n >= 128:
        tile_n = 128
    else:
        tile_n = max((tile_n // 8) * 8, 8)
    return int(tile_n), int(tile_k)


# --------------------------------- forward ----------------------------------


def pca_forward(x, dvt_t, bias, out_dim=None):
    """Apply trained PCA: (x - mean) @ dvt.T, computed as x @ dvt_t - bias."""
    n, dim1 = x.shape
    dim1_p, dim2_p = dvt_t.shape
    if out_dim is None:
        out_dim = dim2_p

    x = x.astype(jnp.float32)
    # Feature pad ONLY when the trained buffers were lane-padded; if
    # dim1 % 128 == 0 this branch is skipped and x is passed with no copy.
    if dim1 != dim1_p:
        x = jnp.pad(x, ((0, 0), (0, dim1_p - dim1)))

    tile_n, tile_k = _select_tiles(n, dim1_p, dim2_p)
    n_tiles = pl.cdiv(n, tile_n)
    k_tiles = dim1_p // tile_k

    if k_tiles == 1:
        kernel = _pca_kernel
        scratch_shapes = []
    else:
        kernel = _pca_kernel_ksplit
        scratch_shapes = [pltpu.VMEM((tile_n, dim2_p), jnp.float32)]

    # Explicit scoped-VMEM limit covering resident dvt_t/bias + pipelined
    # x/out tiles (+ accumulator), with headroom; stays below v7x's 64 MiB.
    need = _F32 * (2 * tile_k * dim2_p + 2 * dim2_p
                   + 2 * tile_n * tile_k + 2 * tile_n * dim2_p
                   + (tile_n * dim2_p if k_tiles > 1 else 0))
    vmem_limit = int(min(max(need + need // 4 + (2 << 20), 32 << 20),
                         _VMEM_LIMIT_CAP))

    cost = pl.CostEstimate(
        flops=2 * n * dim1_p * dim2_p,
        transcendentals=0,
        bytes_accessed=_F32 * (n * dim1_p + dim1_p * dim2_p + n * dim2_p),
    )

    out_p = pl.pallas_call(
        kernel,
        out_shape=jax.ShapeDtypeStruct((n, dim2_p), jnp.float32),
        grid_spec=pltpu.PrefetchScalarGridSpec(
            num_scalar_prefetch=0,
            grid=(n_tiles, k_tiles),
            in_specs=[
                # x: tiled over rows (parallel) and features (arbitrary).
                pl.BlockSpec((tile_n, tile_k), lambda i, k: (i, k)),
                # dvt_t: block index constant over rows -> fetched once per K.
                pl.BlockSpec((tile_k, dim2_p), lambda i, k: (k, 0)),
                # bias: tiny, resident.
                pl.BlockSpec((1, dim2_p), lambda i, k: (0, 0)),
            ],
            out_specs=pl.BlockSpec((tile_n, dim2_p), lambda i, k: (i, 0)),
            scratch_shapes=scratch_shapes,
        ),
        compiler_params=pltpu.CompilerParams(
            dimension_semantics=("parallel", "arbitrary"),
            vmem_limit_bytes=vmem_limit,
        ),
        cost_estimate=cost,
    )(x, dvt_t, bias)

    # Strip projection-dim lane padding (no row padding was added).
    return out_p if out_dim == dim2_p else out_p[:, :out_dim]


# ----------------------------------- main ------------------------------------


if __name__ == "__main__":
    # Small shapes consistent with the module: dim1 = input feature dim,
    # dim2 = kept PCA components, N = batch of vectors.
    N, DIM1, DIM2 = 8, 32, 16

    key = jax.random.PRNGKey(0)
    kx, km, kd = jax.random.split(key, 3)

    x = jax.random.normal(kx, (N, DIM1), dtype=jnp.float32)
    # Deterministic synthetic "trained" buffers (module __init__ gives shapes).
    # TODO(synk): train_pca (eigh-based offline fit) is a one-time host-side op,
    # not implemented as a kernel.
    mean = jax.random.normal(km, (1, DIM1), dtype=jnp.float32) * 0.1
    dvt = jax.random.normal(kd, (DIM2, DIM1), dtype=jnp.float32) * 0.05

    # One-time (model-load) precompute of the fixed trained buffers.
    dvt_t, bias = pca_precompute(mean, dvt)
    dvt_t, bias = jax.block_until_ready((dvt_t, bias))

    out = pca_forward(x, dvt_t, bias, out_dim=DIM2)
    out = jax.block_until_ready(out)

    # Reference check (plain JAX) mirroring the PyTorch forward.
    ref = jnp.matmul(dvt, (x - mean).T).T
    assert out.shape == (N, DIM2)
    assert jnp.allclose(out, ref, atol=1e-4, rtol=1e-4)

    print("KERNEL_OK")
</pallas_src>

<mosaic_0001>
module attributes {stable_mosaic.version = 11 : i64} {
  func.func @_pca_kernel(%arg0: i32, %arg1: i32, %arg2: memref<8x128xf32, #tpu.memory_space<vmem>>, %arg3: memref<128x128xf32, #tpu.memory_space<vmem>>, %arg4: memref<1x128xf32, #tpu.memory_space<vmem>>, %arg5: memref<8x128xf32, #tpu.memory_space<vmem>>) attributes {dimension_semantics = [#tpu.dimension_semantics<parallel>, #tpu.dimension_semantics<arbitrary>], iteration_bounds = array<i64: 1, 1>, scalar_prefetch = 0 : i64, scratch_operands = 0 : i64, tpu.core_type = #tpu.core_type<tc>, window_params = [{transform_indices = @transform_0, window_bounds = array<i64: 8, 128>}, {transform_indices = @transform_1, window_bounds = array<i64: 128, 128>}, {pipeline_mode = #tpu.pipeline_mode<synchronous>, transform_indices = @transform_2, window_bounds = array<i64: 1, 128>}, {transform_indices = @transform_3, window_bounds = array<i64: 8, 128>}]} {
    %c0 = arith.constant 0 : index
    %c0_0 = arith.constant 0 : index
    %0 = vector.load %arg2[%c0, %c0_0] : memref<8x128xf32, #tpu.memory_space<vmem>>, vector<8x128xf32>
    %c0_1 = arith.constant 0 : index
    %c0_2 = arith.constant 0 : index
    %1 = vector.load %arg3[%c0_1, %c0_2] : memref<128x128xf32, #tpu.memory_space<vmem>>, vector<128x128xf32>
    %cst = arith.constant dense<0.000000e+00> : vector<8x128xf32>
    %2 = tpu.matmul %0, %1, %cst {dimension_numbers = #tpu.dot_dimension_numbers<[1], [0], [0], [1], [0, 0, 1, 1], [], []>} : vector<8x128xf32>, vector<128x128xf32>, vector<8x128xf32> -> vector<8x128xf32>
    %c0_3 = arith.constant 0 : index
    %c0_4 = arith.constant 0 : index
    %3 = vector.load %arg4[%c0_3, %c0_4] : memref<1x128xf32, #tpu.memory_space<vmem>>, vector<1x128xf32>
    %4 = vector.broadcast %3 : vector<1x128xf32> to vector<8x128xf32>
    %5 = arith.subf %2, %4 : vector<8x128xf32>
    %c0_5 = arith.constant 0 : index
    %c0_6 = arith.constant 0 : index
    %6 = vector.load %arg5[%c0_5, %c0_6] : memref<8x128xf32, #tpu.memory_space<vmem>>, vector<8x128xf32>
    tpu.vector_store %arg5[%c0_5, %c0_6], %5 {strides = array<i32>} : memref<8x128xf32, #tpu.memory_space<vmem>>, vector<8x128xf32>,
    return
  }
  func.func @transform_0(%arg0: i32, %arg1: i32) -> (i32, i32) {
    %c0_i32 = arith.constant 0 : i32
    return %arg0, %arg1 : i32, i32
  }
  func.func @transform_1(%arg0: i32, %arg1: i32) -> (i32, i32) {
    %c0_i32 = arith.constant 0 : i32
    %c0_i32_0 = arith.constant 0 : i32
    return %arg1, %c0_i32 : i32, i32
  }
  func.func @transform_2(%arg0: i32, %arg1: i32) -> (i32, i32) {
    %c0_i32 = arith.constant 0 : i32
    %c0_i32_0 = arith.constant 0 : i32
    %c0_i32_1 = arith.constant 0 : i32
    return %c0_i32, %c0_i32_0 : i32, i32
  }
  func.func @transform_3(%arg0: i32, %arg1: i32) -> (i32, i32) {
    %c0_i32 = arith.constant 0 : i32
    %c0_i32_0 = arith.constant 0 : i32
    return %arg0, %c0_i32 : i32, i32
  }
}

</mosaic_0001>

<bundles_post_ra>
// kernel: tpu_custom_call.1
= control target key start
LH: loop header
LB: loop body
LE: loop exit
PB: predicated region body
PF: predicated region fallthrough
CT: control target
= control target key end

     0   :  { %8 = vsyncpa [#allocation3], 0  ;;  %s318_s0 = inlined_call_operand.hbm [shape: f32[8,128], index: 0, kind: input, shape index: {}]   ;;  %s319_s1 = inlined_call_operand.hbm [shape: f32[128,128], index: 1, kind: input, shape index: {}]   ;;  %s320_s2 = inlined_call_operand.vmem [shape: f32[1,128], index: 2, kind: input, shape index: {}]   ;;  %s321_s3 = inlined_call_operand.hbm [shape: f32[8,128], index: 3, kind: output, shape index: {}]  }
   0x1   :  { %9 = vsyncpa [#allocation6], 0 }
   0x2   :  { %10 = vsyncpa [#allocation4], 0  ;;  %s279_s12 = smov [#allocation2]   ;;  %s280_s14 = smov [#allocation5]  }
   0x3   :  { %s17_s13 = sshll.u32 %s279_s12, 4  ;;  %s26_s15 = sshll.u32 %s280_s14, 4  ;;  %s18_s13 = int_to_ptr.vmem [resolvable:$true] %s17_s13  ;;  %s27_s15 = int_to_ptr.vmem [resolvable:$true] %s26_s15 }
   0x4   :  { %s221_s16 = scalar_lea.vmem %s18_s13, 128  ;;  %p226_p1 = scmp.lt.s32.totalorder %s18_s13, %s18_s13 }
   0x5   :  { %p222_p0 = scmp.ne.s32.totalorder %s18_s13, %s221_s16  ;;  %p227_p2 = scmp.lt.s32.totalorder %s221_s16, %s221_s16 }
   0x7   :  { %p228_p3 = por %p227_p2, %p226_p1 }
   0x9   :  { %p229_p4 = pnand %p228_p3, %p222_p0 }
   0xb   :  { %232 = shalt.err (!%p229_p4)
}
   0xc   :  { %20 = dma.hbm_to_vmem [thread:$0]  %s318_s0, 128, %s18_s13, [#allocation3]  }
   0xd   :  { %s241_s19 = scalar_lea.vmem %s27_s15, 2048  ;;  %p246_p6 = scmp.lt.s32.totalorder %s27_s15, %s27_s15 }
   0xe   :  { %p242_p5 = scmp.ne.s32.totalorder %s27_s15, %s241_s19  ;;  %p247_p7 = scmp.lt.s32.totalorder %s241_s19, %s241_s19 }
  0x10   :  { %p248_p8 = por %p247_p7, %p246_p6 }
  0x12   :  { %p249_p9 = pnand %p248_p8, %p242_p5 }
  0x14   :  { %252 = shalt.err (!%p249_p9)
}
  0x15   :  { %s281_s20 = smov 128   ;;  %s282_s21 = smov 8  }
  0x16   :  { %32 = dma.hbm_to_vmem [thread:$0]  %s319_s1, 2048, %s27_s15, [#allocation6], %s281_s20, %s281_s20, %s282_s21  }
  0x17   :  { %273 = dma.done.wait [#allocation3], 128  }
  0x18   :  { %274 = vsyncadd [#allocation3], 4294967168 }
  0x19   :  { %275 = dma.done.wait [#allocation6], 2048  }
  0x1a   :  { %276 = vsyncadd [#allocation6], 4294965248  ;;  %v283_v0 = vmov 0.0   ;;  %vm284_vm0 = vmmov 0   ;;  %v57_v1 = vld [vmem:[#allocation5 + $0x78] sm:$0xff]  ;;  %v56_v2 = vld [vmem:[#allocation5 + $0x70] sm:$0xff] }
  0x1b   :  { %171 = vmatprep.subr.mxu0 %v283_v0  ;;  %203 = vmatprep.mubr.msk.f32.mxu0 %vm284_vm0, %v283_v0  ;;  %v55_v3 = vld [vmem:[#allocation5 + $0x68] sm:$0xff]  ;;  %v54_v4 = vld [vmem:[#allocation5 + $0x60] sm:$0xff]  ;;  %v53_v5 = vld [vmem:[#allocation5 + $0x58] sm:$0xff]  ;;  %s285_s24 = smov [#allocation7]  }
  0x1c   :  { %172 = vmatpush3.msra.mxu0 %v57_v1  ;;  %v52_v6 = vld [vmem:[#allocation5 + $0x50] sm:$0xff]  ;;  %v51_v7 = vld [vmem:[#allocation5 + $0x48] sm:$0xff]  ;;  %v50_v8 = vld [vmem:[#allocation5 + $0x40] sm:$0xff]  ;;  %s143_s25 = sshll.u32 %s285_s24, 4  ;;  %s144_s25 = int_to_ptr.vmem [resolvable:$true] %s143_s25 }
  0x1d   :  { %173 = vmatprep.subr.mxu0 %v283_v0  ;;  %v49_v9 = vld [vmem:[#allocation5 + $0x38] sm:$0xff]  ;;  %v48_v10 = vld [vmem:[#allocation5 + $0x30] sm:$0xff]  ;;  %v47_v11 = vld [vmem:[#allocation5 + $0x28] sm:$0xff]  ;;  %s253_s26 = scalar_lea.vmem %s144_s25, 128  ;;  %p258_p11 = scmp.lt.s32.totalorder %s144_s25, %s144_s25 }
  0x1e   :  { %174 = vmatpush3.msra.mxu0 %v56_v2  ;;  %v46_v12 = vld [vmem:[#allocation5 + $0x20] sm:$0xff]  ;;  %v45_v13 = vld [vmem:[#allocation5 + $0x18] sm:$0xff]  ;;  %v44_v14 = vld [vmem:[#allocation5 + $0x10] sm:$0xff]  ;;  %p254_p10 = scmp.ne.s32.totalorder %s144_s25, %s253_s26  ;;  %p259_p12 = scmp.lt.s32.totalorder %s253_s26, %s253_s26 }
  0x1f   :  { %175 = vmatprep.subr.mxu0 %v283_v0  ;;  %v43_v15 = vld [vmem:[#allocation5 + $0x8] sm:$0xff]  ;;  %v42_v16 = vld [vmem:[#allocation5] sm:$0xff]  ;;  %v41_v17 = vld [vmem:[#allocation2] sm:$0xff] }
  0x20   :  { %176 = vmatpush3.msra.mxu0 %v55_v3  ;;  %v153_v18 = vld [vmem:[%s320_s2] ss:$0 sm:$0xff]  ;;  %p260_p13 = por %p259_p12, %p258_p11 }
  0x21   :  { %177 = vmatprep.subr.mxu0 %v283_v0 }
  0x22   :  { %178 = vmatpush3.msra.mxu0 %v54_v4  ;;  %p261_p0 = pnand %p260_p13, %p254_p10 }
  0x23   :  { %179 = vmatprep.subr.mxu0 %v283_v0 }
  0x24   :  { %180 = vmatpush3.msra.mxu0 %v53_v5 }
  0x25   :  { %181 = vmatprep.subr.mxu0 %v283_v0 }
  0x26   :  { %182 = vmatpush3.msra.mxu0 %v52_v6 }
  0x27   :  { %183 = vmatprep.subr.mxu0 %v283_v0 }
  0x28   :  { %184 = vmatpush3.msra.mxu0 %v51_v7 }
  0x29   :  { %185 = vmatprep.subr.mxu0 %v283_v0 }
  0x2a   :  { %186 = vmatpush3.msra.mxu0 %v50_v8 }
  0x2b   :  { %187 = vmatprep.subr.mxu0 %v283_v0 }
  0x2c   :  { %188 = vmatpush3.msra.mxu0 %v49_v9 }
  0x2d   :  { %189 = vmatprep.subr.mxu0 %v283_v0 }
  0x2e   :  { %190 = vmatpush3.msra.mxu0 %v48_v10 }
  0x2f   :  { %191 = vmatprep.subr.mxu0 %v283_v0 }
  0x30   :  { %192 = vmatpush3.msra.mxu0 %v47_v11 }
  0x31   :  { %193 = vmatprep.subr.mxu0 %v283_v0 }
  0x32   :  { %194 = vmatpush3.msra.mxu0 %v46_v12 }
  0x33   :  { %195 = vmatprep.subr.mxu0 %v283_v0 }
  0x34   :  { %196 = vmatpush3.msra.mxu0 %v45_v13 }
  0x35   :  { %197 = vmatprep.subr.mxu0 %v283_v0 }
  0x36   :  { %198 = vmatpush3.msra.mxu0 %v44_v14 }
  0x37   :  { %199 = vmatprep.subr.mxu0 %v283_v0 }
  0x38   :  { %200 = vmatpush3.msra.mxu0 %v43_v15 }
  0x39   :  { %201 = vmatprep.subr.mxu0 %v283_v0 }
  0x3a   :  { %202 = vmatpush3.msra.mxu0 %v42_v16 }
  0x3b   :  { %204 = vmatmul.mubr.f32.vlgmr.msra.gmra.mxu0 %v41_v17 }
  0xfb   :  { %v124_v19 = vpop.f32.mrf.mxu0 }
  0xfc   :  { %v135_v20 = vsub.f32 %v124_v19, %v153_v18 }
  0xfd   :  { %v205_v21 = vpop.f32.mrf.mxu0 }
  0xfe   :  { %136 = vst [vmem:[#allocation7] sm:$0xff] %v135_v20 }
  0xff   :  { %264 = shalt.err (!%p261_p0)
}
 0x100   :  { %146 = dma.vmem_to_hbm [thread:$0]  %s144_s25, 128, %s321_s3, [#allocation4]  }
 0x101   :  { %277 = dma.done.wait [#allocation4], 128  }
 0x102   :  { %278 = vsyncadd [#allocation4], 4294967168 }
 0x103   :  { %150 = vsyncpa [#allocation3], 1 }
 0x104   :  { %151 = vsyncpa [#allocation6], 1 }
 0x105   :  { %152 = vsyncpa [#allocation4], 1 }

</bundles_post_ra>
